<compile_context>
chip_gen: v6e
topology: v6e:2x2x1
jax: 0.10.0
libtpu: 0.0.40
codegen_flags: <defaults>
</compile_context>

<pallas_src>
import math

import jax
import jax.numpy as jnp
from jax.experimental import pallas as pl
from jax.experimental.pallas import tpu as pltpu


# ---------------------------------------------------------------------------
# Kernel bodies
# ---------------------------------------------------------------------------
def _transpose2d_kernel(x_ref, o_ref):
    # (TA, TB) -> (TB, TA): one bulk minor transpose (XLU) per block.
    o_ref[...] = x_ref[...].T


def _transpose_minor_q_kernel(x_ref, o_ref):
    # (TA, TQ, TB) -> (TB, TQ, TA).  TQ is tiled into the grid (<= 8), so this
    # unroll is tiny and per-block VMEM is bounded independent of Q.
    # TODO(synk): replace the per-q loop with one jnp.swapaxes(x, 0, 2) once
    # Mosaic's general (non-minor) transpose lowering is confirmed available.
    for q in range(x_ref.shape[1]):
        o_ref[:, q, :] = x_ref[:, q, :].T


def _copy_swap_q1_kernel(x_ref, o_ref):
    # Minor axis untouched, Q == 1.  (TA, TB, R) -> (TB, TA, R).
    # The A<->B permutation lives in the BlockSpec index maps; in-tile we do
    # per-b slab copies: strided read, dense (TA, R) write (stores are the
    # scarcer slot, especially on v5e).
    for b in range(x_ref.shape[1]):
        o_ref[b] = x_ref[:, b, :]


def _copy_swap_kernel(x_ref, o_ref):
    # Minor axis untouched, Q > 1 (rare).  (TA, TQ, TB, R) -> (TB, TQ, TA, R).
    # TQ, TB are both bounded (<= 8) by the wrapper, so the unroll is <= 64.
    for q in range(x_ref.shape[1]):
        for b in range(x_ref.shape[2]):
            o_ref[b, q] = x_ref[:, q, b, :]


# ---------------------------------------------------------------------------
# Tile-size / VMEM helpers
# ---------------------------------------------------------------------------
def _pick_tile(dim, cap, align):
    """Tile for `dim`: the full dim if it fits under `cap`, else an
    `align`-multiple <= cap, preferring one that divides `dim` evenly so the
    last grid step is not a ragged (masked-store) tile."""
    if dim <= cap:
        return dim
    cap_al = max((cap // align) * align, align)
    t = cap_al
    while t >= align:
        if dim % t == 0:
            return t
        t -= align
    return cap_al


def _vmem_plan():
    """(per-block byte budget, vmem_limit_bytes), generation-aware."""
    cap = 64 * 1024 * 1024
    try:
        info = pltpu.get_tpu_info()
        cap = getattr(info, "vmem_capacity_bytes", cap) or cap
    except Exception:
        pass
    if cap >= 96 * 1024 * 1024:                      # v5e / v6e: 128 MiB VMEM
        return 6 * 1024 * 1024, 64 * 1024 * 1024
    return 2 * 1024 * 1024, 32 * 1024 * 1024         # v7x: 64 MiB VMEM


# ---------------------------------------------------------------------------
# Wrapper: trans(dim1, dim2).forward(x)
# ---------------------------------------------------------------------------
def pallas_transpose(x, dim1, dim2):
    nd = x.ndim
    d1, d2 = dim1 % nd, dim2 % nd
    if d1 == d2:
        return x
    if d1 > d2:
        d1, d2 = d2, d1

    shape = x.shape
    out_full = list(shape)
    out_full[d1], out_full[d2] = out_full[d2], out_full[d1]
    out_full = tuple(out_full)

    P = math.prod(shape[:d1])
    A = shape[d1]
    Q = math.prod(shape[d1 + 1:d2])
    B = shape[d2]
    R = math.prod(shape[d2 + 1:])

    # Adjacent swap with a size-1 partner is a pure reshape (no data movement).
    if Q == 1 and (A == 1 or B == 1):
        return x.reshape(out_full)

    itemsize = jnp.dtype(x.dtype).itemsize
    block_budget, vmem_limit = _vmem_plan()
    cost = pl.CostEstimate(flops=0, transcendentals=0,
                           bytes_accessed=2 * math.prod(shape) * itemsize)

    def _params(grid_rank):
        # TODO(synk): on v7x ensure >=2 grid steps across parallel axes when
        # P == 1 so both TensorCores get work (minor win, omitted for clarity).
        return pltpu.CompilerParams(
            dimension_semantics=("parallel",) * grid_rank,
            vmem_limit_bytes=vmem_limit)

    if R == 1 and Q == 1:
        # --- Fast path: swap reaches the minor axis, nothing in between. ---
        xv = x.reshape(P, A, B)
        cap_elems = max(block_budget // itemsize, 128 * 128)
        side = max((math.isqrt(cap_elems) // 128) * 128, 128)
        TA = _pick_tile(A, side, 128)   # lane dim of the output block
        TB = _pick_tile(B, side, 128)   # lane dim of the input block
        grid = (P, pl.cdiv(A, TA), pl.cdiv(B, TB))
        out = pl.pallas_call(
            _transpose2d_kernel,
            out_shape=jax.ShapeDtypeStruct((P, B, A), x.dtype),
            grid=grid,
            in_specs=[pl.BlockSpec((None, TA, TB), lambda p, ia, ib: (p, ia, ib))],
            out_specs=pl.BlockSpec((None, TB, TA), lambda p, ia, ib: (p, ib, ia)),
            compiler_params=_params(3),
            cost_estimate=cost,
        )(xv)
        return out.reshape(out_full)

    if R == 1:
        # --- Swap reaches the minor axis, Q > 1: tile Q into the grid. ---
        xv = x.reshape(P, A, Q, B)
        TQ = Q if Q <= 8 else 8
        cap_elems = max(block_budget // (itemsize * TQ), 128 * 128)
        side = max((math.isqrt(cap_elems) // 128) * 128, 128)
        TA = _pick_tile(A, side, 128)
        TB = _pick_tile(B, side, 128)
        grid = (P, pl.cdiv(A, TA), pl.cdiv(Q, TQ), pl.cdiv(B, TB))
        out = pl.pallas_call(
            _transpose_minor_q_kernel,
            out_shape=jax.ShapeDtypeStruct((P, B, Q, A), x.dtype),
            grid=grid,
            in_specs=[pl.BlockSpec((None, TA, TQ, TB),
                                   lambda p, ia, iq, ib: (p, ia, iq, ib))],
            out_specs=pl.BlockSpec((None, TB, TQ, TA),
                                   lambda p, ia, iq, ib: (p, ib, iq, ia)),
            compiler_params=_params(4),
            cost_estimate=cost,
        )(xv)
        return out.reshape(out_full)

    if Q == 1:
        # --- Minor axis untouched (R > 1), adjacent swap. ---
        # TODO(synk): when R < 128 the stores are masked (<128-lane minor dim);
        # folding A into the output lane axis would fix it but needs an
        # in-tile blocked-lane relayout — left for a later iteration.
        xv = x.reshape(P, A, B, R)
        max_unroll = 64
        tb_cap = max(min(max_unroll,
                         block_budget // (8 * R * itemsize)) // 8 * 8, 8)
        TB = B if B <= tb_cap else _pick_tile(B, tb_cap, 8)
        max_ta = max((block_budget // (TB * R * itemsize)) // 8 * 8, 8)
        TA = _pick_tile(A, max_ta, 8)
        grid = (P, pl.cdiv(A, TA), pl.cdiv(B, TB))
        out = pl.pallas_call(
            _copy_swap_q1_kernel,
            out_shape=jax.ShapeDtypeStruct((P, B, A, R), x.dtype),
            grid=grid,
            in_specs=[pl.BlockSpec((None, TA, TB, R),
                                   lambda p, ia, ib: (p, ia, ib, 0))],
            out_specs=pl.BlockSpec((None, TB, TA, R),
                                   lambda p, ia, ib: (p, ib, ia, 0)),
            compiler_params=_params(3),
            cost_estimate=cost,
        )(xv)
        return out.reshape(out_full)

    # --- Minor axis untouched (R > 1) and Q > 1 (rare). ---
    xv = x.reshape(P, A, Q, B, R)
    TQ = Q if Q <= 8 else 8
    TB = B if B <= 8 else _pick_tile(B, 8, 8)       # bounded unroll: TQ*TB <= 64
    max_ta = max((block_budget // (TQ * TB * R * itemsize)) // 8 * 8, 8)
    TA = _pick_tile(A, max_ta, 8)
    grid = (P, pl.cdiv(A, TA), pl.cdiv(Q, TQ), pl.cdiv(B, TB))
    out = pl.pallas_call(
        _copy_swap_kernel,
        out_shape=jax.ShapeDtypeStruct((P, B, Q, A, R), x.dtype),
        grid=grid,
        in_specs=[pl.BlockSpec((None, TA, TQ, TB, R),
                               lambda p, ia, iq, ib: (p, ia, iq, ib, 0))],
        out_specs=pl.BlockSpec((None, TB, TQ, TA, R),
                               lambda p, ia, iq, ib: (p, ib, iq, ia, 0)),
        compiler_params=_params(4),
        cost_estimate=cost,
    )(xv)
    return out.reshape(out_full)


class Trans:
    """JAX/Pallas equivalent of the PyTorch `trans(dim1, dim2)` module."""

    def __init__(self, dim1, dim2):
        self.dim1 = dim1
        self.dim2 = dim2

    def __call__(self, x):
        return pallas_transpose(x, self.dim1, self.dim2)


if __name__ == "__main__":
    key = jax.random.PRNGKey(0)
    k1, k2, k3, k4 = jax.random.split(key, 4)

    t12 = Trans(1, 2)
    t13 = Trans(1, 3)

    # Case 1: trans(1, 2) on (B, C, N) -> minor-swap fast path (Q==1, R==1).
    x3 = jax.random.normal(k1, (2, 32, 64), jnp.float32)
    y3 = jax.jit(t12)(x3)
    jax.block_until_ready(y3)
    assert y3.shape == (2, 64, 32)
    assert bool(jnp.array_equal(y3, jnp.swapaxes(x3, 1, 2)))

    # Case 2: trans(1, 2) on a 4-D tensor, minor axis untouched (Q==1, R==128).
    x4 = jax.random.normal(k2, (2, 8, 16, 128), jnp.float32)
    y4 = jax.jit(t12)(x4)
    jax.block_until_ready(y4)
    assert y4.shape == (2, 16, 8, 128)
    assert bool(jnp.array_equal(y4, jnp.swapaxes(x4, 1, 2)))

    # Case 3: non-adjacent swap trans(1, 3) (Q>1, R==1).
    x5 = jax.random.normal(k3, (2, 8, 4, 64), jnp.float32)
    y5 = jax.jit(t13)(x5)
    jax.block_until_ready(y5)
    assert y5.shape == (2, 64, 4, 8)
    assert bool(jnp.array_equal(y5, jnp.swapaxes(x5, 1, 3)))

    # Case 4: non-adjacent swap with an untouched minor axis (Q>1, R>1).
    x6 = jax.random.normal(k4, (2, 6, 4, 8, 32), jnp.float32)
    y6 = jax.jit(t13)(x6)
    jax.block_until_ready(y6)
    assert y6.shape == (2, 8, 4, 6, 32)
    assert bool(jnp.array_equal(y6, jnp.swapaxes(x6, 1, 3)))

    print("KERNEL_OK")
</pallas_src>

<mosaic_0001>
module attributes {stable_mosaic.version = 11 : i64} {
  func.func @_transpose2d_kernel(%arg0: i32, %arg1: i32, %arg2: i32, %arg3: memref<1x32x64xf32, #tpu.memory_space<vmem>>, %arg4: memref<1x64x32xf32, #tpu.memory_space<vmem>>) attributes {dimension_semantics = [#tpu.dimension_semantics<parallel>, #tpu.dimension_semantics<parallel>, #tpu.dimension_semantics<parallel>], iteration_bounds = array<i64: 2, 1, 1>, scalar_prefetch = 0 : i64, scratch_operands = 0 : i64, tpu.core_type = #tpu.core_type<tc>, window_params = [{transform_indices = @transform_0, window_bounds = array<i64: 1, 32, 64>}, {transform_indices = @transform_1, window_bounds = array<i64: 1, 64, 32>}]} {
    %c0 = arith.constant 0 : index
    %c0_0 = arith.constant 0 : index
    %c0_1 = arith.constant 0 : index
    %0 = vector.load %arg3[%c0, %c0_0, %c0_1] : memref<1x32x64xf32, #tpu.memory_space<vmem>>, vector<1x32x64xf32>
    %1 = vector.shape_cast %0 : vector<1x32x64xf32> to vector<32x64xf32>
    %2 = tpu.transpose %1, [1, 0] : vector<32x64xf32> -> vector<64x32xf32>
    %c0_2 = arith.constant 0 : index
    %c0_3 = arith.constant 0 : index
    %c0_4 = arith.constant 0 : index
    %3 = vector.load %arg4[%c0_2, %c0_3, %c0_4] : memref<1x64x32xf32, #tpu.memory_space<vmem>>, vector<1x64x32xf32>
    %4 = vector.shape_cast %3 : vector<1x64x32xf32> to vector<64x32xf32>
    %5 = vector.shape_cast %2 : vector<64x32xf32> to vector<1x64x32xf32>
    tpu.vector_store %arg4[%c0_2, %c0_3, %c0_4], %5 {strides = array<i32>} : memref<1x64x32xf32, #tpu.memory_space<vmem>>, vector<1x64x32xf32>,
    return
  }
  func.func @transform_0(%arg0: i32, %arg1: i32, %arg2: i32) -> (i32, i32, i32) {
    %c0_i32 = arith.constant 0 : i32
    return %arg0, %arg1, %arg2 : i32, i32, i32
  }
  func.func @transform_1(%arg0: i32, %arg1: i32, %arg2: i32) -> (i32, i32, i32) {
    %c0_i32 = arith.constant 0 : i32
    return %arg0, %arg2, %arg1 : i32, i32, i32
  }
}

</mosaic_0001>

<bundles_post_ra>
// kernel: _unnamed_function_.1
= control target key start
LH: loop header
LB: loop body
LE: loop exit
PB: predicated region body
PF: predicated region fallthrough
CT: control target
= control target key end

     0   :  { %6 = vsyncpa [#allocation3], 0  ;;  %s607_s0 = inlined_call_operand.hbm [shape: f32[2,32,64], index: 0, kind: input, shape index: {}]   ;;  %s608_s1 = inlined_call_operand.vmem [shape: f32[2,64,32], index: 1, kind: output, shape index: {}]  }
   0x1   :  { %8 = vsyncpa [#allocation3 + $0x1], 0  ;;  %s503_s6 = smov 0   ;;  %s505_s7 = smov 0  }
   0x2   :  { %s507_s8 = smov 0   ;;  %s509_s9 = smov 0  }
   0x3   :  { %s511_s10 = smov 0   ;;  %s513_s11 = smov 0  }
   0x4 LB: > { %s337_s12 = sadd.s32 4294967295, %s488_s11   ;;  %s33_s13 = sadd.s32 1, %s484_s10  ;;  %s488_s11 = sphi %s513_s11, %s14_s11   ;;  %s484_s10 = sphi %s511_s10, %s616_s10   ;;  %s480_s9 = sphi %s509_s9, %s615_s9   ;;  %s476_s8 = sphi %s507_s8, %s614_s8   ;;  %s472_s7 = sphi %s505_s7, %s613_s7   ;;  %s468_s6 = sphi %s503_s6, %s612_s6  }
   0x5   : > { %p35_p0 = scmp.ge.s32.totalorder %s33_s13, 2  ;;  %s44_s14 = sadd.s32 1, %s476_s8 }
   0x6   : > { %p51_p1 = scmp.ne.s32.totalorder %s476_s8, %s472_s7  ;;  %p52_p2 = scmp.eq.s32.totalorder %s488_s11, 0 }
   0x7   : > { %s618_s13 = smov (%p35_p0, %s33_s13), 0  ;;  %p57_p4 = scmp.ne.s32.totalorder %s472_s7, %s468_s6 }
   0x8   : > { %p539_p3 = por %p52_p2, %p51_p1  ;;  %s37_s16 = ssub.s32 %s484_s10, %s618_s13 }
   0x9   : > { %p58_p5 = scmp.eq.s32.totalorder %s337_s12, 0  ;;  %p42_p6 = scmp.eq.s32.totalorder %s37_s16, 0 }
   0xa   : > { %p358_p8 = scmp.lt.s32.totalorder %s488_s11, 2  ;;  %s111_s19 = sand.u32 1, %s476_s8  }
   0xb   : > { %p546_p7 = por %p58_p5, %p57_p4  ;;  %s350_s20 = sshll.u32 %s484_s10, 9 }
   0xc   : > { %s552_s18 = scalar_select %p42_p6, %s476_s8, %s44_s14  }
   0xd   : > { %s341_s21 = sshll.u32 %s111_s19, 5  ;;  %s124_s24 = scalar_lea.hbm %s607_s0, %s350_s20 }
   0xe   : > { %s115_s25 = scalar_lea.vmem [#allocation2], %s341_s21  ;;  %p561_p9 = pnand %p358_p8, %p539_p3 }
   0xf   : > { %s125_s26 = sshll.u32 %s115_s25, 4  ;;  %s112_s28 = scalar_lea.sflag [#allocation3], %s111_s19  ;;  %s126_s26 = int_to_ptr.vmem [resolvable:$true] %s125_s26 }
  0x10   : > { %p412_p10 = pneg %p561_p9  ;;  %s423_s29 = scalar_lea.vmem %s126_s26, 512 }
  0x11   : > { %p424_p11 = scmp.ne.s32.totalorder %s126_s26, %s423_s29  ;;  %s490_s30 = smov [#allocation2]  }
  0x12   : > { %s428_s2 = sshll.u32 %s490_s30, 4  ;;  %s429_s2 = int_to_ptr.vmem [resolvable:$false] %s428_s2 }
  0x13   : > { %p426_p12 = pnand %p424_p11, %p412_p10  ;;  %s430_s3 = scalar_lea.vmem %s429_s2, 1024 }
  0x14   : > { %p431_p0 = scmp.lt.s32.totalorder %s126_s26, %s429_s2  ;;  %p432_p1 = scmp.lt.s32.totalorder %s430_s3, %s423_s29 }
  0x15   : > { %p427_p13 = pneg %p426_p12 }
  0x16   : > { %p433_p2 = por %p432_p1, %p431_p0 }
  0x18   : > { %p434_p3 = pnand %p433_p2, %p427_p13 }
  0x1a   : > { %437 = shalt.err (!%p434_p3)
}
  0x1b   : > { %s491_s4 = smov 128   ;;  %s492_s5 = smov 8  }
  0x1c   : > { %357 = dma.hbm_to_vmem [thread:$0]  (!%p561_p9), %s124_s24, 512, %s126_s26, %s112_s28, %s491_s4, %s491_s4, %s492_s5  }
  0x1d   : > { %p344_p4 = scmp.ge.s32.totalorder %s488_s11, 1  ;;  %p133_p5 = scmp.lt.s32.totalorder %s488_s11, 3 }
  0x1f   : > { %p134_p6 = pnand %p344_p4, %p133_p5 }
  0x20   : > { %s139_s6 = sand.u32 (!%p134_p6), 1, %s472_s7  }
  0x21   : > { %137 = sbr.rel (%p134_p6) target bundleno = 194 (0xc2), region = 24  ;;  %s345_s12 = sshll.u32 (!%p134_p6), %s139_s6, 5 }
  0x22   : > { %s140_s14 = scalar_lea.sflag (!%p134_p6), [#allocation3], %s139_s6  ;;  %s143_s15 = scalar_lea.vmem (!%p134_p6), [#allocation2], %s345_s12 }
  0x26   : > { %463 = dma.done.wait (%p546_p7), %s140_s14, 512  }
  0x27   : > { %465 = vsyncadd (%p546_p7), %s140_s14, 4294966784  ;;  %v183_v0 = vld [vmem:[%s143_s15] sm:$0xff]  ;;  %v184_v1 = vld [vmem:[%s143_s15 + $0x8] sm:$0xff]  ;;  %p171_p8 = scmp.lt.s32.totalorder %s480_s9, 1  ;;  %vm219_vm0 = vcmask 261120  }
  0x28   : > { %187 = vxpose.xlu0.b32.start [1/4] (short) (narrow) %v183_v0, 64  ;;  %v185_v2 = vld [vmem:[%s143_s15 + $0x10] sm:$0xff]  ;;  %v186_v3 = vld [vmem:[%s143_s15 + $0x18] sm:$0xff] }
  0x29   : > { %s620_s9 = smov (!%p171_p8, %s480_s9), 1 }
  0x2a   : > { %s351_s16 = sshll.u32 %s620_s9, 6 }
  0x2b   : > { %s181_s21 = scalar_lea.vmem %s608_s1, %s351_s16 }
  0x2c   : > { %188 = vxpose.xlu0.b32.cont [2/4] (short) (narrow) %v184_v1, 64 }
  0x30   : > { %189 = vxpose.xlu0.b32.cont [3/4] (short) (narrow) %v185_v2, 64 }
  0x34   : > { %190 = vxpose.xlu0.b32.end [4/4] (short) (narrow) %v186_v3, 64 }
  0xa4   : > { %v203_v4 = vpop.trf.xlu0 }
  0xa5   : > { %220 = vst.msk [vmem:[%s181_s21] sm:$0xff] %vm219_vm0, %v203_v4 }
  0xa8   : > { %v204_v5 = vpop.trf.xlu0 }
  0xa9   : > { %221 = vst.msk [vmem:[%s181_s21 + $0x8] sm:$0xff] %vm219_vm0, %v204_v5 }
  0xac   : > { %v205_v6 = vpop.trf.xlu0 }
  0xad   : > { %222 = vst.msk [vmem:[%s181_s21 + $0x10] sm:$0xff] %vm219_vm0, %v205_v6 }
  0xb0   : > { %v206_v7 = vpop.trf.xlu0 }
  0xb1   : > { %223 = vst.msk [vmem:[%s181_s21 + $0x18] sm:$0xff] %vm219_vm0, %v206_v7 }
  0xb4   : > { %v207_v8 = vpop.trf.xlu0 }
  0xb5   : > { %224 = vst.msk [vmem:[%s181_s21 + $0x20] sm:$0xff] %vm219_vm0, %v207_v8 }
  0xb8   : > { %v208_v9 = vpop.trf.xlu0 }
  0xb9   : > { %225 = vst.msk [vmem:[%s181_s21 + $0x28] sm:$0xff] %vm219_vm0, %v208_v9 }
  0xbc   : > { %v209_v10 = vpop.trf.xlu0 }
  0xbd   : > { %226 = vst.msk [vmem:[%s181_s21 + $0x30] sm:$0xff] %vm219_vm0, %v209_v10 }
  0xc0   : > { %v210_v11 = vpop.trf.xlu0 }
  0xc1   : > { %227 = vst.msk [vmem:[%s181_s21 + $0x38] sm:$0xff] %vm219_vm0, %v210_v11 }
  0xc2 PF: > { %s14_s11 = sadd.s32 1, %s488_s11   ;;  %s612_s6 = smov %s472_s7 }
  0xc3   : > { %p11_p7 = scmp.ge.s32.totalorder %s14_s11, 4   ;;  %s613_s7 = smov %s476_s8 }
  0xc4   : > { %s614_s8 = smov %s552_s18  ;;  %s615_s9 = smov %s484_s10 }
  0xc5   : > { %s616_s10 = smov %s618_s13  ;;  %13 = sbr.rel (!%p11_p7) target bundleno = 4 (0x4), region = 64 }
  0xca   :  { %264 = vsyncpa [#allocation3], 1 }
  0xcb   :  { %266 = vsyncpa [#allocation3 + $0x1], 1 }

</bundles_post_ra>
